<compile_context>
chip_gen: v7x
topology: tpu7x:2x2x1
jax: 0.10.0
libtpu: 0.0.40
codegen_flags: <defaults>
</compile_context>

<pallas_src>
import functools
import math

import jax
import jax.numpy as jnp
from jax import lax
from jax.experimental import pallas as pl
from jax.experimental.pallas import tpu as pltpu

LANE = 128
_MAX_CHUNK = 512  # inner-loop chunk over batch lanes (keeps hidden ~vreg-resident)


def _round_up(a, m):
    return (a + m - 1) // m * m


def mlp_kernel(x_ref, w1_ref, b1_ref, w2_ref, b2_ref, o_ref, *, chunk):
    # x_ref : [TB, n_in]    native layout (batch on sublanes, features tiny)
    # w1_ref: [n_hid, n_in] ; b1_ref / w2_ref: [n_hid, 1] ; b2_ref: [1, 1] (SMEM)
    # o_ref : [1, TB]       lane-dense output tile (batch on lanes)
    n_hid = w1_ref.shape[0]
    tb = x_ref.shape[0]
    n_chunks = tb // chunk

    w1 = w1_ref[...]
    # Hoist the lane-broadcasts of b1 / w2 out of the inner loop
    # (JAX does not CSE broadcast_in_dim).
    b1 = jnp.broadcast_to(b1_ref[...], (n_hid, chunk))
    w2 = jnp.broadcast_to(w2_ref[...], (n_hid, chunk))
    b2 = b2_ref[0, 0]

    def body(c, carry):
        off = pl.multiple_of(c * chunk, chunk)
        x_blk = x_ref[pl.ds(off, chunk), :]                          # [chunk, n_in]
        # First layer on the MXU ("NT" matmul): W1 @ x_blk^T -> [n_hid, chunk].
        pre = lax.dot_general(w1, x_blk, (((1,), (1,)), ((), ())),
                              preferred_element_type=jnp.float32) + b1
        # sigmoid via tanh: a single EUP transcendental per element.
        h = 0.5 * (jnp.tanh(0.5 * pre) + 1.0)
        # Width-1 output layer: VPU multiply + sublane (XLU) reduction.
        y = jnp.sum(h * w2, axis=0, keepdims=True) + b2              # [1, chunk]
        o_ref[:, pl.ds(off, chunk)] = y.astype(o_ref.dtype)
        return carry

    lax.fori_loop(0, n_chunks, body, 0)


def prepare_params(w1, b1, w2, b2):
    """One-time parameter preprocessing (hoisted out of the per-call hot path)."""
    n_hid = w1.shape[0]
    return (jnp.asarray(w1, jnp.float32),                     # [n_hid, n_in] native layout
            jnp.asarray(b1, jnp.float32).reshape(n_hid, 1),   # [n_hid, 1]
            jnp.asarray(w2, jnp.float32).reshape(n_hid, 1),   # [n_hid, 1]
            jnp.asarray(b2, jnp.float32).reshape(1, 1))       # [1, 1]  (SMEM scalar)


@functools.partial(jax.jit, static_argnames=("block_b",))
def magic_conti_nn_forward(x, params, *, block_b=16 * 1024):
    """x: [B, n_inputs]; params from prepare_params().  Returns [B, 1] float32.

    block_b: batch-tile size in lanes.  The 16K default amortises per-grid-step
    overhead while keeping the per-step VMEM footprint (~2 * TB * 512 B for the
    lane-padded [TB, n_in] x tile) well under a v7x TensorCore's 64 MiB VMEM;
    keep it <= ~32K for that reason.
    """
    w1m, b1c, w2c, b2s = params
    x = jnp.asarray(x, jnp.float32)
    B, n_in = x.shape
    n_hid = w1m.shape[0]

    # --- batch tiling -------------------------------------------------------
    B_lane = _round_up(B, LANE)                       # lane-granular batch
    TB = min(_round_up(block_b, LANE), B_lane)
    if B_lane // TB < 2 and B_lane >= 2 * LANE:
        # Ensure the "parallel" grid axis has >= 2 steps so a v7x chip can split
        # the batch across its two TensorCores (no-op on v5e / v6e).
        TB = _round_up(pl.cdiv(B_lane, 2), LANE)
    B_pad = _round_up(B, TB)
    nb = B_pad // TB
    chunk = math.gcd(TB, _MAX_CHUNK)                  # 128 / 256 / 512, divides TB

    # Pad only along the batch (cheap, no transpose); a no-op when B % TB == 0.
    if B_pad != B:
        x = jnp.pad(x, ((0, B_pad - B), (0, 0)))

    # --- VMEM budget & cost hint ---------------------------------------------
    vmem_budget = (2 * TB * LANE * 4        # double-buffered x tile ([TB, n_in] lane-pads to 128)
                   + 2 * 8 * TB * 4         # double-buffered [1, TB] output (sublane-pads to 8)
                   + 8 * n_hid * chunk * 4  # in-flight hidden-chunk temporaries
                   + 4 * n_hid * LANE * 4   # resident params (lane-padded)
                   + (8 << 20))             # compiler-internal scratch headroom
    vmem_limit = max(int(vmem_budget), 32 << 20)

    cost = pl.CostEstimate(
        flops=int(2 * B_pad * n_hid * (n_in + 1)),
        transcendentals=int(B_pad * n_hid),
        bytes_accessed=int(4 * (B_pad * n_in + B_pad
                                + n_hid * n_in + 2 * n_hid + 1)))

    yt = pl.pallas_call(
        functools.partial(mlp_kernel, chunk=chunk),
        out_shape=jax.ShapeDtypeStruct((1, B_pad), jnp.float32),
        grid=(nb,),
        in_specs=[
            pl.BlockSpec((TB, n_in), lambda i: (i, 0)),          # x, native layout, batch-tiled
            pl.BlockSpec((n_hid, n_in), lambda i: (0, 0)),       # W1   (resident)
            pl.BlockSpec((n_hid, 1), lambda i: (0, 0)),          # b1   (resident)
            pl.BlockSpec((n_hid, 1), lambda i: (0, 0)),          # w2   (resident)
            pl.BlockSpec(memory_space=pltpu.MemorySpace.SMEM),   # b2 scalar in SMEM
        ],
        out_specs=pl.BlockSpec((1, TB), lambda i: (0, i)),       # lane-dense output
        compiler_params=pltpu.CompilerParams(
            dimension_semantics=("parallel",),
            vmem_limit_bytes=vmem_limit),
        cost_estimate=cost,
    )(x, w1m, b1c, w2c, b2s)

    return yt[0, :B].reshape(B, 1)


def reference_forward(x, w1, b1, w2, b2):
    h = jax.nn.sigmoid(x @ w1.T + b1)
    return h @ w2.T + b2


if __name__ == "__main__":
    n_inputs, n_hidden = 4, 32

    key = jax.random.PRNGKey(0)
    kx, k1, k2, k3, k4, kx2 = jax.random.split(key, 6)

    # Deterministic init mimicking nn.Linear's U(-1/sqrt(fan_in), 1/sqrt(fan_in)).
    bound1 = 1.0 / jnp.sqrt(jnp.float32(n_inputs))
    bound2 = 1.0 / jnp.sqrt(jnp.float32(n_hidden))
    w1 = jax.random.uniform(k1, (n_hidden, n_inputs), jnp.float32, -bound1, bound1)
    b1 = jax.random.uniform(k2, (n_hidden,), jnp.float32, -bound1, bound1)
    w2 = jax.random.uniform(k3, (1, n_hidden), jnp.float32, -bound2, bound2)
    b2 = jax.random.uniform(k4, (1,), jnp.float32, -bound2, bound2)

    params = prepare_params(w1, b1, w2, b2)   # one-time, out of the hot path

    # Small, module-sized batch (single 128-lane tile).
    x_small = jax.random.normal(kx, (8, n_inputs), jnp.float32)
    out_small = jax.block_until_ready(magic_conti_nn_forward(x_small, params))
    ref_small = reference_forward(x_small, w1, b1, w2, b2)
    assert out_small.shape == (8, 1)
    assert jnp.allclose(out_small, ref_small, atol=1e-3, rtol=1e-3)

    # Non-aligned batch exercising batch padding and a multi-step parallel grid.
    x_big = jax.random.normal(kx2, (300, n_inputs), jnp.float32)
    out_big = jax.block_until_ready(magic_conti_nn_forward(x_big, params, block_b=128))
    ref_big = reference_forward(x_big, w1, b1, w2, b2)
    assert out_big.shape == (300, 1)
    assert jnp.allclose(out_big, ref_big, atol=1e-3, rtol=1e-3)

    # Same batch through the default large-tile path (nb >= 2 split logic).
    out_big2 = jax.block_until_ready(magic_conti_nn_forward(x_big, params))
    assert jnp.allclose(out_big2, ref_big, atol=1e-3, rtol=1e-3)

    # TODO(synk): training utilities of the module (SGD optimizer, MSELoss, fit)
    # are host-side PyTorch machinery and are intentionally not implemented.

    print("KERNEL_OK")
</pallas_src>

<mosaic_0001>
module attributes {stable_mosaic.version = 11 : i64} {
  func.func @mlp_kernel(%arg0: i32, %arg1: memref<128x4xf32, #tpu.memory_space<vmem>>, %arg2: memref<32x4xf32, #tpu.memory_space<vmem>>, %arg3: memref<32x1xf32, #tpu.memory_space<vmem>>, %arg4: memref<32x1xf32, #tpu.memory_space<vmem>>, %arg5: memref<1x1xf32, #tpu.memory_space<smem>>, %arg6: memref<1x128xf32, #tpu.memory_space<vmem>>) attributes {dimension_semantics = [#tpu.dimension_semantics<parallel>], iteration_bounds = array<i64: 1>, scalar_prefetch = 0 : i64, scratch_operands = 0 : i64, tpu.core_type = #tpu.core_type<tc>, window_params = [{transform_indices = @transform_0, window_bounds = array<i64: 128, 4>}, {pipeline_mode = #tpu.pipeline_mode<synchronous>, transform_indices = @transform_1, window_bounds = array<i64: 32, 4>}, {pipeline_mode = #tpu.pipeline_mode<synchronous>, transform_indices = @transform_2, window_bounds = array<i64: 32, 1>}, {pipeline_mode = #tpu.pipeline_mode<synchronous>, transform_indices = @transform_3, window_bounds = array<i64: 32, 1>}, {transform_indices = @transform_4, window_bounds = array<i64: 1, 1>}, {transform_indices = @transform_5, window_bounds = array<i64: 1, 128>}]} {
    %c0 = arith.constant 0 : index
    %c0_0 = arith.constant 0 : index
    %0 = vector.load %arg2[%c0, %c0_0] : memref<32x4xf32, #tpu.memory_space<vmem>>, vector<32x4xf32>
    %c0_1 = arith.constant 0 : index
    %c0_2 = arith.constant 0 : index
    %1 = vector.load %arg3[%c0_1, %c0_2] : memref<32x1xf32, #tpu.memory_space<vmem>>, vector<32x1xf32>
    %2 = vector.shape_cast %1 : vector<32x1xf32> to vector<32x1xf32>
    %3 = vector.broadcast %2 : vector<32x1xf32> to vector<32x128xf32>
    %c0_3 = arith.constant 0 : index
    %c0_4 = arith.constant 0 : index
    %4 = vector.load %arg4[%c0_3, %c0_4] : memref<32x1xf32, #tpu.memory_space<vmem>>, vector<32x1xf32>
    %5 = vector.shape_cast %4 : vector<32x1xf32> to vector<32x1xf32>
    %6 = vector.broadcast %5 : vector<32x1xf32> to vector<32x128xf32>
    %c0_5 = arith.constant 0 : index
    %c0_6 = arith.constant 0 : index
    %7 = memref.load %arg5[%c0_5, %c0_6] : memref<1x1xf32, #tpu.memory_space<smem>>
    %c0_i32 = arith.constant 0 : i32
    %c128_i32 = arith.constant 128 : i32
    %8 = arith.muli %c0_i32, %c128_i32 : i32
    %9 = tpu.assume_multiple %8, 128 : i32
    %10 = arith.index_cast %9 : i32 to index
    %c0_7 = arith.constant 0 : index
    %11 = vector.load %arg1[%10, %c0_7] : memref<128x4xf32, #tpu.memory_space<vmem>>, vector<128x4xf32>
    %cst = arith.constant dense<0.000000e+00> : vector<32x128xf32>
    %12 = tpu.matmul %0, %11, %cst {dimension_numbers = #tpu.dot_dimension_numbers<[1], [1], [0], [0], [0, 0, 1, 0], [], []>} : vector<32x4xf32>, vector<128x4xf32>, vector<32x128xf32> -> vector<32x128xf32>
    %13 = arith.addf %12, %3 : vector<32x128xf32>
    %cst_8 = arith.constant 5.000000e-01 : f32
    %14 = vector.broadcast %cst_8 : f32 to vector<32x128xf32>
    %15 = arith.mulf %14, %13 : vector<32x128xf32>
    %16 = math.tanh %15 : vector<32x128xf32>
    %cst_9 = arith.constant 1.000000e+00 : f32
    %17 = vector.broadcast %cst_9 : f32 to vector<32x128xf32>
    %18 = arith.addf %16, %17 : vector<32x128xf32>
    %cst_10 = arith.constant 5.000000e-01 : f32
    %19 = vector.broadcast %cst_10 : f32 to vector<32x128xf32>
    %20 = arith.mulf %19, %18 : vector<32x128xf32>
    %21 = arith.mulf %20, %6 : vector<32x128xf32>
    %cst_11 = arith.constant dense<0.000000e+00> : vector<128xf32>
    %22 = vector.multi_reduction <add>, %21, %cst_11 [0] : vector<32x128xf32> to vector<128xf32>
    %23 = vector.shape_cast %22 : vector<128xf32> to vector<1x128xf32>
    %24 = vector.broadcast %7 : f32 to vector<1x128xf32>
    %25 = arith.addf %23, %24 : vector<1x128xf32>
    %c0_12 = arith.constant 0 : index
    %26 = arith.index_cast %9 : i32 to index
    %27 = vector.load %arg6[%c0_12, %26] : memref<1x128xf32, #tpu.memory_space<vmem>>, vector<1x128xf32>
    tpu.vector_store %arg6[%c0_12, %26], %25 {strides = array<i32>} : memref<1x128xf32, #tpu.memory_space<vmem>>, vector<1x128xf32>,
    %c1_i32 = arith.constant 1 : i32
    return
  }
  func.func @transform_0(%arg0: i32) -> (i32, i32) {
    %c0_i32 = arith.constant 0 : i32
    %c0_i32_0 = arith.constant 0 : i32
    return %arg0, %c0_i32 : i32, i32
  }
  func.func @transform_1(%arg0: i32) -> (i32, i32) {
    %c0_i32 = arith.constant 0 : i32
    %c0_i32_0 = arith.constant 0 : i32
    %c0_i32_1 = arith.constant 0 : i32
    return %c0_i32, %c0_i32_0 : i32, i32
  }
  func.func @transform_2(%arg0: i32) -> (i32, i32) {
    %c0_i32 = arith.constant 0 : i32
    %c0_i32_0 = arith.constant 0 : i32
    %c0_i32_1 = arith.constant 0 : i32
    return %c0_i32, %c0_i32_0 : i32, i32
  }
  func.func @transform_3(%arg0: i32) -> (i32, i32) {
    %c0_i32 = arith.constant 0 : i32
    %c0_i32_0 = arith.constant 0 : i32
    %c0_i32_1 = arith.constant 0 : i32
    return %c0_i32, %c0_i32_0 : i32, i32
  }
  func.func @transform_4(%arg0: i32) -> (i32, i32) {
    %c0_i32 = arith.constant 0 : i32
    %c0_i32_0 = arith.constant 0 : i32
    %c0_i32_1 = arith.constant 0 : i32
    return %c0_i32, %c0_i32_0 : i32, i32
  }
  func.func @transform_5(%arg0: i32) -> (i32, i32) {
    %c0_i32 = arith.constant 0 : i32
    %c0_i32_0 = arith.constant 0 : i32
    return %c0_i32, %arg0 : i32, i32
  }
}

</mosaic_0001>

<bundles_post_ra>
// kernel: magic_conti_nn_forward.1
= control target key start
LH: loop header
LB: loop body
LE: loop exit
PB: predicated region body
PF: predicated region fallthrough
CT: control target
= control target key end

     0   :  { %vm90_vm0 = vcmask 31744   ;;  %v425_v3 = vmov 0   ;;  %s620_s0 = inlined_call_operand.vmem [shape: f32[128,4], index: 0, kind: input, shape index: {}]   ;;  %s621_s1 = inlined_call_operand.vmem [shape: f32[32,4], index: 1, kind: input, shape index: {}]   ;;  %s622_s2 = inlined_call_operand.vmem [shape: f32[32,1], index: 2, kind: input, shape index: {}]   ;;  %s623_s3 = inlined_call_operand.vmem [shape: f32[32,1], index: 3, kind: input, shape index: {}]   ;;  %s624_s4 = inlined_call_operand.<no memory space> [shape: f32[1,1], index: 4, kind: input, shape index: {}]   ;;  %s625_s5 = inlined_call_operand.vmem [shape: f32[1,128], index: 5, kind: output, shape index: {}]  }
   0x1   :  { %v74_v0 = vld [vmem:[%s620_s0] sm:$0xff]  ;;  %v75_v1 = vld [vmem:[%s620_s0 + $0x8] sm:$0xff]  ;;  %vm464_vm1 = vmpackc.low %vm90_vm0, %vm90_vm0  ;;  %415 = vset.pattern.permute.xlu0 %v425_v3  ;;  %416 = vset.pattern.permute.xlu1 %v425_v3 }
   0x2   :  { %v350_v4 = vpack.c.bf16 %v75_v1, %v74_v0  ;;  %v76_v5 = vld [vmem:[%s620_s0 + $0x10] sm:$0xff]  ;;  %v77_v6 = vld [vmem:[%s620_s0 + $0x18] sm:$0xff]  ;;  %v21_v8 = vld [vmem:[%s621_s1] sm:$0xff] }
   0x3   :  { %v356_v7 = vpack.c.bf16 %v77_v6, %v76_v5  ;;  %v78_v9 = vld [vmem:[%s620_s0 + $0x20] sm:$0xff]  ;;  %v79_v10 = vld [vmem:[%s620_s0 + $0x28] sm:$0xff]  ;;  %344 = vmatprep.mubr.msk.f32.mxu0 %vm90_vm0, %v21_v8  ;;  %v23_v11 = vld [vmem:[%s621_s1 + $0x10] sm:$0xff] }
   0x4   :  { %352 = vmatprep.subr.msk.bf16.mxu0 %vm464_vm1, %v350_v4  ;;  %398 = vmatprep.subr.msk.bf16.mxu1 %vm464_vm1, %v350_v4  ;;  %v25_v12 = vld [vmem:[%s622_s2] sm:$0xff]  ;;  %v27_v13 = vld [vmem:[%s622_s2 + $0x10] sm:$0xff]  ;;  %v362_v14 = vpack.c.bf16 %v79_v10, %v78_v9  ;;  %v26_v15 = vld [vmem:[%s622_s2 + $0x8] sm:$0xff] }
   0x5   :  { %355 = vmatpush3.bf16.xpose.msk.msra.mxu0 %vm464_vm1, %v350_v4  ;;  %406 = vmatpush3.bf16.xpose.msk.msra.mxu1 %vm464_vm1, %v350_v4  ;;  %v28_v16 = vld [vmem:[%s622_s2 + $0x18] sm:$0xff]  ;;  %v80_v17 = vld [vmem:[%s620_s0 + $0x30] sm:$0xff]  ;;  %v49_v19 = vld [vmem:[%s623_s3] sm:$0xff] }
   0x6   :  { %358 = vmatprep.subr.msk.bf16.mxu0 %vm464_vm1, %v356_v7  ;;  %399 = vmatprep.subr.msk.bf16.mxu1 %vm464_vm1, %v356_v7  ;;  %v81_v18 = vld [vmem:[%s620_s0 + $0x38] sm:$0xff]  ;;  %v50_v20 = vld [vmem:[%s623_s3 + $0x8] sm:$0xff]  ;;  %v51_v22 = vld [vmem:[%s623_s3 + $0x10] sm:$0xff] }
   0x7   :  { %347 = vmatprep.mubr.msk.f32.mxu1 %vm90_vm0, %v23_v11  ;;  %31 = vperm.xlu0 %415, %v25_v12   ;;  %v368_v21 = vpack.c.bf16 %v81_v18, %v80_v17  ;;  %v52_v23 = vld [vmem:[%s623_s3 + $0x18] sm:$0xff]  ;;  %v82_v24 = vld [vmem:[%s620_s0 + $0x40] sm:$0xff]  ;;  %v83_v25 = vld [vmem:[%s620_s0 + $0x48] sm:$0xff]  ;;  %v265_v18 = vstv %s624_s4 }
   0x8   :  { %41 = vperm.xlu1 %416, %v27_v13   ;;  %v374_v26 = vpack.c.bf16 %v83_v25, %v82_v24  ;;  %v84_v27 = vld [vmem:[%s620_s0 + $0x50] sm:$0xff]  ;;  %v85_v28 = vld [vmem:[%s620_s0 + $0x58] sm:$0xff]  ;;  %v86_v30 = vld [vmem:[%s620_s0 + $0x60] sm:$0xff] }
   0x9   :  { %v380_v29 = vpack.c.bf16 %v85_v28, %v84_v27  ;;  %v87_v31 = vld [vmem:[%s620_s0 + $0x68] sm:$0xff]  ;;  %v88_v33 = vld [vmem:[%s620_s0 + $0x70] sm:$0xff]  ;;  %v89_v34 = vld [vmem:[%s620_s0 + $0x78] sm:$0xff] }
   0xa   :  { %v386_v32 = vpack.c.bf16 %v87_v31, %v86_v30  ;;  %v392_v35 = vpack.c.bf16 %v89_v34, %v88_v33  ;;  %v22_v36 = vld [vmem:[%s621_s1 + $0x8] sm:$0xff]  ;;  %v24_v37 = vld [vmem:[%s621_s1 + $0x18] sm:$0xff] }
   0xb   :  { %36 = vperm.xlu0 %415, %v26_v15  }
   0xc   :  { %46 = vperm.xlu1 %416, %v28_v16  }
   0xd   :  { %361 = vmatpush3.bf16.xpose.msk.msra.mxu0 %vm464_vm1, %v356_v7  ;;  %407 = vmatpush3.bf16.xpose.msk.msra.mxu1 %vm464_vm1, %v356_v7 }
   0xe   :  { %364 = vmatprep.subr.msk.bf16.mxu0 %vm464_vm1, %v362_v14  ;;  %400 = vmatprep.subr.msk.bf16.mxu1 %vm464_vm1, %v362_v14 }
   0xf   :  { %55 = vperm.xlu0 %415, %v49_v19  }
  0x10   :  { %60 = vperm.xlu1 %416, %v50_v20  }
  0x13   :  { %65 = vperm.xlu0 %415, %v51_v22  }
  0x14   :  { %70 = vperm.xlu1 %416, %v52_v23  }
  0x15   :  { %367 = vmatpush3.bf16.xpose.msk.msra.mxu0 %vm464_vm1, %v362_v14  ;;  %408 = vmatpush3.bf16.xpose.msk.msra.mxu1 %vm464_vm1, %v362_v14 }
  0x16   :  { %370 = vmatprep.subr.msk.bf16.mxu0 %vm464_vm1, %v368_v21  ;;  %401 = vmatprep.subr.msk.bf16.mxu1 %vm464_vm1, %v368_v21 }
  0x1d   :  { %373 = vmatpush3.bf16.xpose.msk.msra.mxu0 %vm464_vm1, %v368_v21  ;;  %409 = vmatpush3.bf16.xpose.msk.msra.mxu1 %vm464_vm1, %v368_v21 }
  0x1e   :  { %376 = vmatprep.subr.msk.bf16.mxu0 %vm464_vm1, %v374_v26  ;;  %402 = vmatprep.subr.msk.bf16.mxu1 %vm464_vm1, %v374_v26 }
  0x25   :  { %379 = vmatpush3.bf16.xpose.msk.msra.mxu0 %vm464_vm1, %v374_v26  ;;  %410 = vmatpush3.bf16.xpose.msk.msra.mxu1 %vm464_vm1, %v374_v26 }
  0x26   :  { %382 = vmatprep.subr.msk.bf16.mxu0 %vm464_vm1, %v380_v29  ;;  %403 = vmatprep.subr.msk.bf16.mxu1 %vm464_vm1, %v380_v29 }
  0x2d   :  { %385 = vmatpush3.bf16.xpose.msk.msra.mxu0 %vm464_vm1, %v380_v29  ;;  %411 = vmatpush3.bf16.xpose.msk.msra.mxu1 %vm464_vm1, %v380_v29 }
  0x2e   :  { %388 = vmatprep.subr.msk.bf16.mxu0 %vm464_vm1, %v386_v32  ;;  %404 = vmatprep.subr.msk.bf16.mxu1 %vm464_vm1, %v386_v32 }
  0x35   :  { %391 = vmatpush3.bf16.xpose.msk.msra.mxu0 %vm464_vm1, %v386_v32  ;;  %412 = vmatpush3.bf16.xpose.msk.msra.mxu1 %vm464_vm1, %v386_v32 }
  0x36   :  { %394 = vmatprep.subr.msk.bf16.mxu0 %vm464_vm1, %v392_v35  ;;  %405 = vmatprep.subr.msk.bf16.mxu1 %vm464_vm1, %v392_v35 }
  0x3d   :  { %397 = vmatpush3.bf16.xpose.msk.msra.mxu0 %vm464_vm1, %v392_v35  ;;  %413 = vmatpush3.bf16.xpose.msk.msra.mxu1 %vm464_vm1, %v392_v35 }
  0x44   :  { %345 = vmatmul.mubr.msk.f32.vlgmr.msra.gmra.mrb[0].mxu0 %vm90_vm0, %v22_v36  ;;  %348 = vmatmul.mubr.msk.f32.vlgmr.msra.gmra.mrb[0].mxu1 %vm90_vm0, %v24_v37 }
  0x86   :  { %v32_v38 = vpop.permute.xlu0 %31 }
  0x87   :  { %v42_v39 = vpop.permute.xlu1 %41 }
  0x8a   :  { %v37_v40 = vpop.permute.xlu0 %36 }
  0x8b   :  { %v47_v41 = vpop.permute.xlu1 %46 }
  0x8e   :  { %v56_v58 = vpop.permute.xlu0 %55 }
  0x8f   :  { %v61_v63 = vpop.permute.xlu1 %60 }
  0x92   :  { %v66_v6 = vpop.permute.xlu0 %65 }
  0x93   :  { %v71_v9 = vpop.permute.xlu1 %70 }
 0x117   :  { %v346_v42 = vpop.f32.mrb[0].mxu0  ;;  %v349_v43 = vpop.f32.mrb[0].mxu1 }
 0x118   :  { %v223_v44 = vadd.f32 %v346_v42, %v37_v40  ;;  %v233_v45 = vadd.f32 %v349_v43, %v47_v41  ;;  %v217_v46 = vpop.f32.mrb[1].mxu0  ;;  %v227_v47 = vpop.f32.mrb[1].mxu1 }
 0x119   :  { %v218_v48 = vadd.f32 %v217_v46, %v32_v38  ;;  %v228_v49 = vadd.f32 %v227_v47, %v42_v39 }
 0x11a   :  { %v237_v50 = vmul.f32 0.5, %v223_v44  ;;  %v239_v51 = vmul.f32 0.5, %v233_v45 }
 0x11b   :  { %v236_v52 = vmul.f32 0.5, %v218_v48  ;;  %v238_v53 = vmul.f32 0.5, %v228_v49 }
 0x11c   :  { %417 = vtanh.f32 %v237_v50 }
 0x11d   :  { %419 = vtanh.f32 %v239_v51 }
 0x11e   :  { %421 = vtanh.f32 %v236_v52 }
 0x11f   :  { %423 = vtanh.f32 %v238_v53 }
 0x126   :  { %v418_v54 = vpop.eup %417 }
 0x127   :  { %v420_v55 = vpop.eup %419  ;;  %v245_v56 = vadd.f32 1.0, %v418_v54 }
 0x128   :  { %v422_v57 = vpop.eup %421  ;;  %v247_v61 = vadd.f32 1.0, %v420_v55 }
 0x129   :  { %v424_v59 = vpop.eup %423  ;;  %v249_v60 = vmul.f32 0.5, %v245_v56  ;;  %v244_v62 = vadd.f32 1.0, %v422_v57 }
 0x12a   :  { %v246_v0 = vadd.f32 1.0, %v424_v59  ;;  %v251_v4 = vmul.f32 0.5, %v247_v61 }
 0x12b   :  { %v253_v1 = vmul.f32 %v249_v60, %v61_v63  ;;  %v248_v2 = vmul.f32 0.5, %v244_v62 }
 0x12c   :  { %v250_v3 = vmul.f32 0.5, %v246_v0  ;;  %v255_v10 = vmul.f32 %v251_v4, %v71_v9 }
 0x12d   :  { %v252_v5 = vmul.f32 %v248_v2, %v56_v58 }
 0x12e   :  { %v254_v8 = vmul.f32 %v250_v3, %v66_v6 }
 0x12f   :  { %v256_v7 = vadd.f32 %v253_v1, %v252_v5 }
 0x131   :  { %v257_v11 = vadd.f32 %v256_v7, %v254_v8 }
 0x133   :  { %v258_v12 = vadd.f32 %v257_v11, %v255_v10 }
 0x135   :  { %v259_v13 = vrot.slane %v258_v12, 4 }
 0x137   :  { %v260_v14 = vadd.f32 %v259_v13, %v258_v12 }
 0x139   :  { %v261_v15 = vrot.slane %v260_v14, 2 }
 0x13b   :  { %v262_v16 = vadd.f32 %v261_v15, %v260_v14 }
 0x13d   :  { %v263_v17 = vrot.slane %v262_v16, 1 }
 0x13f   :  { %v264_v19 = vadd.f32 %v263_v17, %v262_v16 }
 0x141   :  { %v266_v20 = vadd.f32 %v265_v18, %v264_v19 }
 0x143   :  { %267 = vst [vmem:[%s625_s5] sm:$0x1] %v266_v20 }

</bundles_post_ra>
